<compile_context>
chip_gen: v6e
topology: v6e:2x2x1
jax: 0.10.0
libtpu: 0.0.40
codegen_flags: <defaults>
</compile_context>

<pallas_src>
import functools

import jax
import jax.numpy as jnp
from jax import lax
from jax.experimental import pallas as pl
from jax.experimental.pallas import tpu as pltpu


_MAX_CHUNK = 64  # timesteps per grid step (multiple of 8 -> sublane-dense)


def _lstm_chunk_kernel(x_ref, stm0_ref, ltm0_ref, wih_ref, whh_ref, b_ref,
                       consts_ref, gates_ref, stm_ref, ltm_ref,
                       stm_sc, ltm_sc, xproj_sc):
    """One grid step == CHUNK LSTM timesteps.

    x_ref      : (CHUNK, D)   input block (streamed per chunk)
    stm0_ref   : (1, H)       initial hidden state (resident; read at chunk 0)
    ltm0_ref   : (1, H)       initial cell state   (resident; read at chunk 0)
    wih_ref    : (D, 4H)      W_ih^T  (resident)
    whh_ref    : (H, 4H)      W_hh^T  (resident)
    b_ref      : (1, 4H)      b_ih + b_hh (resident)
    consts_ref : (3, 4H)      rows = [pre_scale, post_scale, post_bias]
    gates_ref  : (CHUNK, 4H)  per-step activated gates [f | i | c | o]
    stm_ref    : (CHUNK, H)   per-step hidden state
    ltm_ref    : (CHUNK, H)   per-step cell state
    stm_sc, ltm_sc : (1, H)   f32 scratch carried across grid steps
    xproj_sc   : (CHUNK, 4H)  f32 scratch for the chunk's input projection
    """
    H = stm0_ref.shape[-1]
    CHUNK = x_ref.shape[0]
    ci = pl.program_id(0)

    @pl.when(ci == 0)
    def _():
        stm_sc[...] = stm0_ref[...]
        ltm_sc[...] = ltm0_ref[...]

    # Input half of the gates for the whole chunk in ONE M=CHUNK matmul
    # (hoisted out of the recurrence), bias folded in.
    xproj_sc[...] = (
        jnp.dot(x_ref[...].astype(wih_ref.dtype), wih_ref[...],
                preferred_element_type=jnp.float32) + b_ref[...])

    pre = consts_ref[0:1, :]      # 0.5 on f/i/o lanes, 1.0 on c lanes
    post_s = consts_ref[1:2, :]   # 0.5 on f/i/o lanes, 1.0 on c lanes
    post_b = consts_ref[2:3, :]   # 0.5 on f/i/o lanes, 0.0 on c lanes

    def body(t, carry):
        stm, ltm = carry
        xp = xproj_sc[pl.ds(t, 1), :]                      # (1, 4H)
        gates = xp + jnp.dot(stm.astype(whh_ref.dtype), whh_ref[...],
                             preferred_element_type=jnp.float32)
        # sigmoid(x)=0.5*tanh(x/2)+0.5 on f/i/o lanes; tanh(x) on c lanes.
        act = jnp.tanh(gates * pre) * post_s + post_b      # (1, 4H)

        f = act[:, 0 * H:1 * H]
        i = act[:, 1 * H:2 * H]
        c = act[:, 2 * H:3 * H]
        o = act[:, 3 * H:4 * H]

        ltm_new = i * c + ltm * f
        stm_new = jnp.tanh(ltm_new) * o

        gates_ref[pl.ds(t, 1), :] = act                    # lane-dense (4H)
        stm_ref[pl.ds(t, 1), :] = stm_new
        ltm_ref[pl.ds(t, 1), :] = ltm_new
        return stm_new, ltm_new

    stm_f, ltm_f = lax.fori_loop(0, CHUNK, body,
                                 (stm_sc[...], ltm_sc[...]), unroll=True)
    stm_sc[...] = stm_f
    ltm_sc[...] = ltm_f


@jax.jit
def _lstm_seq_pallas(x_seq, stm0, ltm0, wih_t, whh_t, bias, act_consts):
    """Run T LSTM steps in a single pallas_call (time chunked).

    x_seq: (T, 1, D); stm0/ltm0: (1, H); wih_t: (D, 4H); whh_t: (H, 4H);
    bias: (1, 4H); act_consts: (3, 4H).
    Returns (stm_seq (T,1,H), ltm_seq (T,1,H), gates_seq (T,4,H)).
    """
    T, _, D = x_seq.shape
    H = stm0.shape[-1]
    x2d = x_seq.reshape(T, D)

    chunk = T if T <= _MAX_CHUNK else _MAX_CHUNK
    n_chunks = pl.cdiv(T, chunk)
    t_pad = n_chunks * chunk
    if t_pad != T:
        x2d = jnp.pad(x2d, ((0, t_pad - T), (0, 0)))

    gates, stm_seq, ltm_seq = pl.pallas_call(
        _lstm_chunk_kernel,
        out_shape=(jax.ShapeDtypeStruct((t_pad, 4 * H), jnp.float32),
                   jax.ShapeDtypeStruct((t_pad, H), jnp.float32),
                   jax.ShapeDtypeStruct((t_pad, H), jnp.float32)),
        grid=(n_chunks,),
        in_specs=[
            pl.BlockSpec((chunk, D), lambda c: (c, 0)),      # x (streamed)
            pl.BlockSpec((1, H), lambda c: (0, 0)),          # STM0 (resident)
            pl.BlockSpec((1, H), lambda c: (0, 0)),          # LTM0 (resident)
            pl.BlockSpec((D, 4 * H), lambda c: (0, 0)),      # W_ih^T
            pl.BlockSpec((H, 4 * H), lambda c: (0, 0)),      # W_hh^T
            pl.BlockSpec((1, 4 * H), lambda c: (0, 0)),      # fused bias
            pl.BlockSpec((3, 4 * H), lambda c: (0, 0)),      # activation consts
        ],
        out_specs=(pl.BlockSpec((chunk, 4 * H), lambda c: (c, 0)),
                   pl.BlockSpec((chunk, H), lambda c: (c, 0)),
                   pl.BlockSpec((chunk, H), lambda c: (c, 0))),
        scratch_shapes=[pltpu.VMEM((1, H), jnp.float32),       # STM carry
                        pltpu.VMEM((1, H), jnp.float32),       # LTM carry
                        pltpu.VMEM((chunk, 4 * H), jnp.float32)],  # x proj
        compiler_params=pltpu.CompilerParams(
            dimension_semantics=("arbitrary",)),  # recurrence -> sequential
    )(x2d, stm0, ltm0, wih_t, whh_t, bias, act_consts)

    gates_seq = gates[:T].reshape(T, 4, H)        # rows = f, i, c, o
    stm_seq = stm_seq[:T][:, None, :]             # (T, 1, H)
    ltm_seq = ltm_seq[:T][:, None, :]             # (T, 1, H)
    return stm_seq, ltm_seq, gates_seq


class NetLSTMPallas:
    """JAX/Pallas port of NET(override='LSTM', lesion='')."""

    def __init__(self, input_dim, hidden_dim, key, weight_dtype=jnp.float32):
        self.input_dim = input_dim
        self.hidden_dim = hidden_dim
        k1, k2, k3, k4 = jax.random.split(key, 4)
        # torch.nn.Linear default init: U(-1/sqrt(fan_in), 1/sqrt(fan_in))
        bi = 1.0 / jnp.sqrt(jnp.float32(input_dim))
        bh = 1.0 / jnp.sqrt(jnp.float32(hidden_dim))
        # Stored in torch layout (out_features, in_features).
        self.weight_ih = jax.random.uniform(k1, (4 * hidden_dim, input_dim),
                                            jnp.float32, -bi, bi)
        self.bias_ih = jax.random.uniform(k2, (4 * hidden_dim,),
                                          jnp.float32, -bi, bi)
        self.weight_hh = jax.random.uniform(k3, (4 * hidden_dim, hidden_dim),
                                            jnp.float32, -bh, bh)
        self.bias_hh = jax.random.uniform(k4, (4 * hidden_dim,),
                                          jnp.float32, -bh, bh)

        # One-time preprocessing (kept out of forward):
        # transposed weights, fused bias, per-lane activation constants.
        # weight_dtype=jnp.bfloat16 halves weight DMA/VMEM and doubles MXU
        # throughput on v6e/v7x (f32 accumulation is preserved in-kernel).
        self.wih_t = self.weight_ih.T.astype(weight_dtype)   # (D, 4H)
        self.whh_t = self.weight_hh.T.astype(weight_dtype)   # (H, 4H)
        self.bias = (self.bias_ih + self.bias_hh)[None, :].astype(jnp.float32)

        half = jnp.full((hidden_dim,), 0.5, jnp.float32)
        one = jnp.ones((hidden_dim,), jnp.float32)
        zero = jnp.zeros((hidden_dim,), jnp.float32)
        pre_scale = jnp.concatenate([half, half, one, half])    # f,i,c,o
        post_scale = pre_scale
        post_bias = jnp.concatenate([half, half, zero, half])
        self.act_consts = jnp.stack([pre_scale, post_scale, post_bias])

    def forward(self, inp, recur):
        """Single step, identical API/semantics to the torch module.

        Note: a T=1 launch is inherently launch/DMA bound; prefer
        forward_sequence for whole sequences.
        """
        stm0 = jnp.squeeze(recur[0], axis=0)      # (1, H)
        ltm0 = jnp.squeeze(recur[1], axis=0)      # (1, H)
        stm_seq, ltm_seq, gates_seq = _lstm_seq_pallas(
            inp, stm0, ltm0, self.wih_t, self.whh_t, self.bias,
            self.act_consts)
        STM = stm_seq[0][None]                    # (1, 1, H)
        LTM = ltm_seq[0][None]                    # (1, 1, H)
        return STM, (STM, LTM), gates_seq[0]      # gates: (4, H)

    def forward_sequence(self, inps, recur):
        """Process a whole (T, 1, D) input sequence in one kernel launch."""
        stm0 = jnp.squeeze(recur[0], axis=0)
        ltm0 = jnp.squeeze(recur[1], axis=0)
        stm_seq, ltm_seq, gates_seq = _lstm_seq_pallas(
            inps, stm0, ltm0, self.wih_t, self.whh_t, self.bias,
            self.act_consts)
        STM = stm_seq[-1][None]
        LTM = ltm_seq[-1][None]
        return stm_seq, (STM, LTM), gates_seq

    # TODO(synk): other override modes (RNN/GRU/exp_decay/FF_mem/FF_int/
    # LSTM_mem/...) keep stateful python-side buffers (self.memory,
    # self.prev_inp) and are not ported; only the 'LSTM' path is implemented.


# ----------------------------- validation ----------------------------------

def _reference_step(net, x2d, stm2d, ltm2d):
    """Pure-JAX single-step reference replicating the torch math."""
    gates = (x2d @ net.weight_ih.T + stm2d @ net.weight_hh.T
             + net.bias_ih + net.bias_hh)
    H = net.hidden_dim
    f = jax.nn.sigmoid(gates[:, 0 * H:1 * H])
    i = jax.nn.sigmoid(gates[:, 1 * H:2 * H])
    c = jnp.tanh(gates[:, 2 * H:3 * H])
    o = jax.nn.sigmoid(gates[:, 3 * H:4 * H])
    ltm_new = i * c + ltm2d * f
    stm_new = jnp.tanh(ltm_new) * o
    return stm_new, ltm_new, jnp.concatenate([f, i, c, o], axis=0)


def _reference_sequence(net, inps, recur):
    stm = jnp.squeeze(recur[0], axis=0)
    ltm = jnp.squeeze(recur[1], axis=0)
    stm_l, ltm_l, gate_l = [], [], []
    for t in range(inps.shape[0]):
        stm, ltm, gates = _reference_step(net, inps[t], stm, ltm)
        stm_l.append(stm)
        ltm_l.append(ltm)
        gate_l.append(gates)
    return jnp.stack(stm_l), jnp.stack(ltm_l), jnp.stack(gate_l)


if __name__ == "__main__":
    input_dim = 32
    hidden_dim = 32
    T = 8

    key = jax.random.PRNGKey(0)
    kp, kx, ks, kl = jax.random.split(key, 4)

    net = NetLSTMPallas(input_dim, hidden_dim, kp)

    inp_seq = jax.random.normal(kx, (T, 1, input_dim), jnp.float32)
    stm0 = jax.random.normal(ks, (1, 1, hidden_dim), jnp.float32)
    ltm0 = jax.random.normal(kl, (1, 1, hidden_dim), jnp.float32)

    # ---- single-step forward (original NET.forward API) ----
    inp = inp_seq[0][None]                              # (1, 1, D)
    STM, (STM2, LTM), gates = net.forward(inp, (stm0, ltm0))
    jax.block_until_ready((STM, LTM, gates))
    rstm, rltm, rgates = _reference_step(
        net, jnp.squeeze(inp, 0), jnp.squeeze(stm0, 0), jnp.squeeze(ltm0, 0))
    assert STM.shape == (1, 1, hidden_dim)
    assert LTM.shape == (1, 1, hidden_dim)
    assert gates.shape == (4, hidden_dim)
    assert jnp.allclose(STM[0], rstm, atol=1e-5, rtol=1e-5)
    assert jnp.allclose(LTM[0], rltm, atol=1e-5, rtol=1e-5)
    assert jnp.allclose(gates, rgates, atol=1e-5, rtol=1e-5)

    # ---- full sequence in ONE kernel launch (T <= CHUNK: single grid step) --
    stm_seq, (STM_f, LTM_f), gates_seq = net.forward_sequence(
        inp_seq, (stm0, ltm0))
    jax.block_until_ready((stm_seq, STM_f, LTM_f, gates_seq))
    rstm_seq, rltm_seq, rgates_seq = _reference_sequence(
        net, inp_seq, (stm0, ltm0))
    assert stm_seq.shape == (T, 1, hidden_dim)
    assert gates_seq.shape == (T, 4, hidden_dim)
    assert jnp.allclose(stm_seq, rstm_seq, atol=1e-5, rtol=1e-5)
    assert jnp.allclose(LTM_f[0], rltm_seq[-1], atol=1e-5, rtol=1e-5)
    assert jnp.allclose(gates_seq, rgates_seq, atol=1e-5, rtol=1e-5)

    # ---- longer sequence exercising time-chunking + padding (T=100 > 64) ----
    T2 = 100
    inp_seq2 = jax.random.normal(jax.random.PRNGKey(7), (T2, 1, input_dim),
                                 jnp.float32)
    stm_seq2, (STM2_f, LTM2_f), gates_seq2 = net.forward_sequence(
        inp_seq2, (stm0, ltm0))
    jax.block_until_ready(stm_seq2)
    rstm2, rltm2, rgates2 = _reference_sequence(net, inp_seq2, (stm0, ltm0))
    assert stm_seq2.shape == (T2, 1, hidden_dim)
    assert jnp.allclose(stm_seq2, rstm2, atol=1e-5, rtol=1e-5)
    assert jnp.allclose(LTM2_f[0], rltm2[-1], atol=1e-5, rtol=1e-5)
    assert jnp.allclose(gates_seq2, rgates2, atol=1e-5, rtol=1e-5)

    # ---- optional bf16-weight variant (v6e/v7x MXU path), looser tol ----
    net_bf16 = NetLSTMPallas(input_dim, hidden_dim, kp,
                             weight_dtype=jnp.bfloat16)
    stm_seq_bf, (STM_bf, LTM_bf), _ = net_bf16.forward_sequence(
        inp_seq, (stm0, ltm0))
    jax.block_until_ready(stm_seq_bf)
    assert jnp.allclose(stm_seq_bf, rstm_seq, atol=5e-2, rtol=5e-2)

    print("KERNEL_OK")
</pallas_src>

<mosaic_0001>
module attributes {stable_mosaic.version = 11 : i64} {
  func.func @_lstm_chunk_kernel(%arg0: i32, %arg1: memref<1x32xf32, #tpu.memory_space<vmem>>, %arg2: memref<1x32xf32, #tpu.memory_space<vmem>>, %arg3: memref<1x32xf32, #tpu.memory_space<vmem>>, %arg4: memref<32x128xf32, #tpu.memory_space<vmem>>, %arg5: memref<32x128xf32, #tpu.memory_space<vmem>>, %arg6: memref<1x128xf32, #tpu.memory_space<vmem>>, %arg7: memref<3x128xf32, #tpu.memory_space<vmem>>, %arg8: memref<1x128xf32, #tpu.memory_space<vmem>>, %arg9: memref<1x32xf32, #tpu.memory_space<vmem>>, %arg10: memref<1x32xf32, #tpu.memory_space<vmem>>, %arg11: memref<1x32xf32, #tpu.memory_space<vmem>>, %arg12: memref<1x32xf32, #tpu.memory_space<vmem>>, %arg13: memref<1x128xf32, #tpu.memory_space<vmem>>) attributes {dimension_semantics = [#tpu.dimension_semantics<arbitrary>], iteration_bounds = array<i64: 1>, scalar_prefetch = 0 : i64, scratch_operands = 3 : i64, tpu.core_type = #tpu.core_type<tc>, window_params = [{transform_indices = @transform_0, window_bounds = array<i64: 1, 32>}, {pipeline_mode = #tpu.pipeline_mode<synchronous>, transform_indices = @transform_1, window_bounds = array<i64: 1, 32>}, {pipeline_mode = #tpu.pipeline_mode<synchronous>, transform_indices = @transform_2, window_bounds = array<i64: 1, 32>}, {pipeline_mode = #tpu.pipeline_mode<synchronous>, transform_indices = @transform_3, window_bounds = array<i64: 32, 128>}, {pipeline_mode = #tpu.pipeline_mode<synchronous>, transform_indices = @transform_4, window_bounds = array<i64: 32, 128>}, {pipeline_mode = #tpu.pipeline_mode<synchronous>, transform_indices = @transform_5, window_bounds = array<i64: 1, 128>}, {pipeline_mode = #tpu.pipeline_mode<synchronous>, transform_indices = @transform_6, window_bounds = array<i64: 3, 128>}, {transform_indices = @transform_7, window_bounds = array<i64: 1, 128>}, {transform_indices = @transform_8, window_bounds = array<i64: 1, 32>}, {transform_indices = @transform_9, window_bounds = array<i64: 1, 32>}]} {
    %c0_i32 = arith.constant 0 : i32
    %0 = arith.cmpi eq, %arg0, %c0_i32 : i32
    %1 = arith.extui %0 : i1 to i32
    %c0_i32_0 = arith.constant 0 : i32
    %2 = arith.cmpi ne, %1, %c0_i32_0 : i32
    scf.if %2 {
      %c0_28 = arith.constant 0 : index
      %c0_29 = arith.constant 0 : index
      %40 = vector.load %arg2[%c0_28, %c0_29] : memref<1x32xf32, #tpu.memory_space<vmem>>, vector<1x32xf32>
      %c0_30 = arith.constant 0 : index
      %c0_31 = arith.constant 0 : index
      %41 = vector.load %arg11[%c0_30, %c0_31] : memref<1x32xf32, #tpu.memory_space<vmem>>, vector<1x32xf32>
      tpu.vector_store %arg11[%c0_30, %c0_31], %40 {strides = array<i32>} : memref<1x32xf32, #tpu.memory_space<vmem>>, vector<1x32xf32>,
      %c0_32 = arith.constant 0 : index
      %c0_33 = arith.constant 0 : index
      %42 = vector.load %arg3[%c0_32, %c0_33] : memref<1x32xf32, #tpu.memory_space<vmem>>, vector<1x32xf32>
      %c0_34 = arith.constant 0 : index
      %c0_35 = arith.constant 0 : index
      %43 = vector.load %arg12[%c0_34, %c0_35] : memref<1x32xf32, #tpu.memory_space<vmem>>, vector<1x32xf32>
      tpu.vector_store %arg12[%c0_34, %c0_35], %42 {strides = array<i32>} : memref<1x32xf32, #tpu.memory_space<vmem>>, vector<1x32xf32>,
    } else {
    }
    %c0 = arith.constant 0 : index
    %c0_1 = arith.constant 0 : index
    %3 = vector.load %arg1[%c0, %c0_1] : memref<1x32xf32, #tpu.memory_space<vmem>>, vector<1x32xf32>
    %c0_2 = arith.constant 0 : index
    %c0_3 = arith.constant 0 : index
    %4 = vector.load %arg4[%c0_2, %c0_3] : memref<32x128xf32, #tpu.memory_space<vmem>>, vector<32x128xf32>
    %cst = arith.constant dense<0.000000e+00> : vector<1x128xf32>
    %5 = tpu.matmul %3, %4, %cst {dimension_numbers = #tpu.dot_dimension_numbers<[1], [0], [0], [1], [0, 0, 1, 1], [], []>} : vector<1x32xf32>, vector<32x128xf32>, vector<1x128xf32> -> vector<1x128xf32>
    %c0_4 = arith.constant 0 : index
    %c0_5 = arith.constant 0 : index
    %6 = vector.load %arg6[%c0_4, %c0_5] : memref<1x128xf32, #tpu.memory_space<vmem>>, vector<1x128xf32>
    %7 = arith.addf %5, %6 : vector<1x128xf32>
    %c0_6 = arith.constant 0 : index
    %c0_7 = arith.constant 0 : index
    %8 = vector.load %arg13[%c0_6, %c0_7] : memref<1x128xf32, #tpu.memory_space<vmem>>, vector<1x128xf32>
    tpu.vector_store %arg13[%c0_6, %c0_7], %7 {strides = array<i32>} : memref<1x128xf32, #tpu.memory_space<vmem>>, vector<1x128xf32>,
    %c0_8 = arith.constant 0 : index
    %c0_9 = arith.constant 0 : index
    %9 = vector.load %arg7[%c0_8, %c0_9] : memref<3x128xf32, #tpu.memory_space<vmem>>, vector<1x128xf32>
    %c1 = arith.constant 1 : index
    %c0_10 = arith.constant 0 : index
    %10 = vector.load %arg7[%c1, %c0_10] : memref<3x128xf32, #tpu.memory_space<vmem>>, vector<1x128xf32>
    %c2 = arith.constant 2 : index
    %c0_11 = arith.constant 0 : index
    %11 = vector.load %arg7[%c2, %c0_11] : memref<3x128xf32, #tpu.memory_space<vmem>>, vector<1x128xf32>
    %c0_12 = arith.constant 0 : index
    %c0_13 = arith.constant 0 : index
    %12 = vector.load %arg11[%c0_12, %c0_13] : memref<1x32xf32, #tpu.memory_space<vmem>>, vector<1x32xf32>
    %c0_14 = arith.constant 0 : index
    %c0_15 = arith.constant 0 : index
    %13 = vector.load %arg12[%c0_14, %c0_15] : memref<1x32xf32, #tpu.memory_space<vmem>>, vector<1x32xf32>
    %c0_i32_16 = arith.constant 0 : i32
    %14 = arith.index_cast %c0_i32_16 : i32 to index
    %c0_17 = arith.constant 0 : index
    %15 = vector.load %arg13[%14, %c0_17] : memref<1x128xf32, #tpu.memory_space<vmem>>, vector<1x128xf32>
    %c0_18 = arith.constant 0 : index
    %c0_19 = arith.constant 0 : index
    %16 = vector.load %arg5[%c0_18, %c0_19] : memref<32x128xf32, #tpu.memory_space<vmem>>, vector<32x128xf32>
    %cst_20 = arith.constant dense<0.000000e+00> : vector<1x128xf32>
    %17 = tpu.matmul %12, %16, %cst_20 {dimension_numbers = #tpu.dot_dimension_numbers<[1], [0], [0], [1], [0, 0, 1, 1], [], []>} : vector<1x32xf32>, vector<32x128xf32>, vector<1x128xf32> -> vector<1x128xf32>
    %18 = arith.addf %15, %17 : vector<1x128xf32>
    %19 = arith.mulf %18, %9 : vector<1x128xf32>
    %20 = math.tanh %19 : vector<1x128xf32>
    %21 = arith.mulf %20, %10 : vector<1x128xf32>
    %22 = arith.addf %21, %11 : vector<1x128xf32>
    %23 = vector.extract_strided_slice %22 {offsets = [0, 0], sizes = [1, 32], strides = [1, 1]} : vector<1x128xf32> to vector<1x32xf32>
    %24 = vector.extract_strided_slice %22 {offsets = [0, 32], sizes = [1, 32], strides = [1, 1]} : vector<1x128xf32> to vector<1x32xf32>
    %25 = vector.extract_strided_slice %22 {offsets = [0, 64], sizes = [1, 32], strides = [1, 1]} : vector<1x128xf32> to vector<1x32xf32>
    %26 = vector.extract_strided_slice %22 {offsets = [0, 96], sizes = [1, 32], strides = [1, 1]} : vector<1x128xf32> to vector<1x32xf32>
    %27 = arith.mulf %24, %25 : vector<1x32xf32>
    %28 = arith.mulf %13, %23 : vector<1x32xf32>
    %29 = arith.addf %27, %28 : vector<1x32xf32>
    %30 = math.tanh %29 : vector<1x32xf32>
    %31 = arith.mulf %30, %26 : vector<1x32xf32>
    %32 = arith.index_cast %c0_i32_16 : i32 to index
    %c0_21 = arith.constant 0 : index
    %33 = vector.load %arg8[%32, %c0_21] : memref<1x128xf32, #tpu.memory_space<vmem>>, vector<1x128xf32>
    tpu.vector_store %arg8[%32, %c0_21], %22 {strides = array<i32>} : memref<1x128xf32, #tpu.memory_space<vmem>>, vector<1x128xf32>,
    %34 = arith.index_cast %c0_i32_16 : i32 to index
    %c0_22 = arith.constant 0 : index
    %35 = vector.load %arg9[%34, %c0_22] : memref<1x32xf32, #tpu.memory_space<vmem>>, vector<1x32xf32>
    tpu.vector_store %arg9[%34, %c0_22], %31 {strides = array<i32>} : memref<1x32xf32, #tpu.memory_space<vmem>>, vector<1x32xf32>,
    %36 = arith.index_cast %c0_i32_16 : i32 to index
    %c0_23 = arith.constant 0 : index
    %37 = vector.load %arg10[%36, %c0_23] : memref<1x32xf32, #tpu.memory_space<vmem>>, vector<1x32xf32>
    tpu.vector_store %arg10[%36, %c0_23], %29 {strides = array<i32>} : memref<1x32xf32, #tpu.memory_space<vmem>>, vector<1x32xf32>,
    %c1_i32 = arith.constant 1 : i32
    %c0_24 = arith.constant 0 : index
    %c0_25 = arith.constant 0 : index
    %38 = vector.load %arg11[%c0_24, %c0_25] : memref<1x32xf32, #tpu.memory_space<vmem>>, vector<1x32xf32>
    tpu.vector_store %arg11[%c0_24, %c0_25], %31 {strides = array<i32>} : memref<1x32xf32, #tpu.memory_space<vmem>>, vector<1x32xf32>,
    %c0_26 = arith.constant 0 : index
    %c0_27 = arith.constant 0 : index
    %39 = vector.load %arg12[%c0_26, %c0_27] : memref<1x32xf32, #tpu.memory_space<vmem>>, vector<1x32xf32>
    tpu.vector_store %arg12[%c0_26, %c0_27], %29 {strides = array<i32>} : memref<1x32xf32, #tpu.memory_space<vmem>>, vector<1x32xf32>,
    return
  }
  func.func @transform_0(%arg0: i32) -> (i32, i32) {
    %c0_i32 = arith.constant 0 : i32
    %c0_i32_0 = arith.constant 0 : i32
    return %arg0, %c0_i32 : i32, i32
  }
  func.func @transform_1(%arg0: i32) -> (i32, i32) {
    %c0_i32 = arith.constant 0 : i32
    %c0_i32_0 = arith.constant 0 : i32
    %c0_i32_1 = arith.constant 0 : i32
    return %c0_i32, %c0_i32_0 : i32, i32
  }
  func.func @transform_2(%arg0: i32) -> (i32, i32) {
    %c0_i32 = arith.constant 0 : i32
    %c0_i32_0 = arith.constant 0 : i32
    %c0_i32_1 = arith.constant 0 : i32
    return %c0_i32, %c0_i32_0 : i32, i32
  }
  func.func @transform_3(%arg0: i32) -> (i32, i32) {
    %c0_i32 = arith.constant 0 : i32
    %c0_i32_0 = arith.constant 0 : i32
    %c0_i32_1 = arith.constant 0 : i32
    return %c0_i32, %c0_i32_0 : i32, i32
  }
  func.func @transform_4(%arg0: i32) -> (i32, i32) {
    %c0_i32 = arith.constant 0 : i32
    %c0_i32_0 = arith.constant 0 : i32
    %c0_i32_1 = arith.constant 0 : i32
    return %c0_i32, %c0_i32_0 : i32, i32
  }
  func.func @transform_5(%arg0: i32) -> (i32, i32) {
    %c0_i32 = arith.constant 0 : i32
    %c0_i32_0 = arith.constant 0 : i32
    %c0_i32_1 = arith.constant 0 : i32
    return %c0_i32, %c0_i32_0 : i32, i32
  }
  func.func @transform_6(%arg0: i32) -> (i32, i32) {
    %c0_i32 = arith.constant 0 : i32
    %c0_i32_0 = arith.constant 0 : i32
    %c0_i32_1 = arith.constant 0 : i32
    return %c0_i32, %c0_i32_0 : i32, i32
  }
  func.func @transform_7(%arg0: i32) -> (i32, i32) {
    %c0_i32 = arith.constant 0 : i32
    %c0_i32_0 = arith.constant 0 : i32
    return %arg0, %c0_i32 : i32, i32
  }
  func.func @transform_8(%arg0: i32) -> (i32, i32) {
    %c0_i32 = arith.constant 0 : i32
    %c0_i32_0 = arith.constant 0 : i32
    return %arg0, %c0_i32 : i32, i32
  }
  func.func @transform_9(%arg0: i32) -> (i32, i32) {
    %c0_i32 = arith.constant 0 : i32
    %c0_i32_0 = arith.constant 0 : i32
    return %arg0, %c0_i32 : i32, i32
  }
}

</mosaic_0001>

<bundles_post_ra>
// kernel: _lstm_seq_pallas.1
= control target key start
LH: loop header
LB: loop body
LE: loop exit
PB: predicated region body
PF: predicated region fallthrough
CT: control target
= control target key end

     0   :  { %15 = vsyncpa [#allocation6], 0  ;;  %s549_s0 = inlined_call_operand.vmem [shape: f32[1,32], index: 0, kind: input, shape index: {}]   ;;  %s550_s1 = inlined_call_operand.vmem [shape: f32[1,32], index: 1, kind: input, shape index: {}]   ;;  %s551_s2 = inlined_call_operand.vmem [shape: f32[1,32], index: 2, kind: input, shape index: {}]   ;;  %s552_s3 = inlined_call_operand.hbm [shape: f32[32,128], index: 3, kind: input, shape index: {}]   ;;  %s553_s4 = inlined_call_operand.hbm [shape: f32[32,128], index: 4, kind: input, shape index: {}]   ;;  %s554_s5 = inlined_call_operand.vmem [shape: f32[1,128], index: 5, kind: input, shape index: {}]   ;;  %s555_s6 = inlined_call_operand.vmem [shape: f32[3,128], index: 6, kind: input, shape index: {}]   ;;  %s556_s7 = inlined_call_operand.vmem [shape: f32[1,128], index: 7, kind: output, shape index: {0}]   ;;  %s557_s8 = inlined_call_operand.hbm [shape: f32[1,32], index: 8, kind: output, shape index: {1}]   ;;  %s558_s9 = inlined_call_operand.hbm [shape: f32[1,32], index: 9, kind: output, shape index: {2}]  }
   0x1   :  { %16 = vsyncpa [#allocation9], 0 }
   0x2   :  { %17 = vsyncpa [#allocation7], 0 }
   0x3   :  { %18 = vsyncpa [#allocation12], 0  ;;  %s446_s30 = smov [#allocation5]  }
   0x4   :  { %s30_s10 = sshll.u32 %s446_s30, 4  ;;  %s31_s10 = int_to_ptr.vmem [resolvable:$true] %s30_s10 }
   0x5   :  { %s366_s11 = scalar_lea.vmem %s31_s10, 512  ;;  %p371_p1 = scmp.lt.s32.totalorder %s31_s10, %s31_s10 }
   0x6   :  { %p367_p0 = scmp.ne.s32.totalorder %s31_s10, %s366_s11  ;;  %p372_p2 = scmp.lt.s32.totalorder %s366_s11, %s366_s11 }
   0x8   :  { %p373_p3 = por %p372_p2, %p371_p1 }
   0xa   :  { %p374_p4 = pnand %p373_p3, %p367_p0 }
   0xc   :  { %377 = shalt.err (!%p374_p4)
}
   0xd   :  { %s447_s12 = smov 128   ;;  %s448_s13 = smov 8  }
   0xe   :  { %36 = dma.hbm_to_vmem [thread:$0]  %s552_s3, 512, %s31_s10, [#allocation6], %s447_s12, %s447_s12, %s448_s13  }
   0xf   :  { %s449_s16 = smov [#allocation8]  }
  0x10   :  { %s42_s17 = sshll.u32 %s449_s16, 4  ;;  %s43_s17 = int_to_ptr.vmem [resolvable:$true] %s42_s17 }
  0x11   :  { %s386_s18 = scalar_lea.vmem %s43_s17, 512  ;;  %p391_p6 = scmp.lt.s32.totalorder %s43_s17, %s43_s17 }
  0x12   :  { %p387_p5 = scmp.ne.s32.totalorder %s43_s17, %s386_s18  ;;  %p392_p7 = scmp.lt.s32.totalorder %s386_s18, %s386_s18 }
  0x14   :  { %p393_p8 = por %p392_p7, %p391_p6 }
  0x16   :  { %p394_p9 = pnand %p393_p8, %p387_p5 }
  0x18   :  { %397 = shalt.err (!%p394_p9)
}
  0x19   :  { %48 = dma.hbm_to_vmem [thread:$0]  %s553_s4, 512, %s43_s17, [#allocation9], %s447_s12, %s447_s12, %s448_s13  }
  0x1a   :  { %438 = dma.done.wait [#allocation6], 512  }
  0x1b   :  { %439 = vsyncadd [#allocation6], 4294966784 }
  0x1c   :  { %440 = dma.done.wait [#allocation9], 512  }
  0x1d   :  { %441 = vsyncadd [#allocation9], 4294966784  ;;  %v450_v0 = vmov 0.0   ;;  %vm451_vm0 = vmmov 0   ;;  %v72_v1 = vld [vmem:[#allocation5 + $0x18] sm:$0xff]  ;;  %v71_v2 = vld [vmem:[#allocation5 + $0x10] sm:$0xff]  ;;  %v255_v30 = vlaneseq }
  0x1e   :  { %321 = vmatprep.subr.mxu0 %v450_v0  ;;  %329 = vmatprep.mubr.msk.f32.mxu0 %vm451_vm0, %v450_v0  ;;  %v158_v3 = vld [vmem:[#allocation8 + $0x18] sm:$0xff]  ;;  %vm64_vm1 = vcmask 253952   ;;  %v70_v4 = vld [vmem:[#allocation5 + $0x8] sm:$0xff]  ;;  %v157_v5 = vld [vmem:[#allocation8 + $0x10] sm:$0xff]  ;;  %vm74_vm2 = vcmask 261120   ;;  %s452_s29 = smov 64  }
  0x1f   :  { %332 = vmatprep.subr.mxu1 %v450_v0  ;;  %340 = vmatprep.mubr.msk.f32.mxu1 %vm451_vm0, %v450_v0  ;;  %v156_v6 = vld [vmem:[#allocation8 + $0x8] sm:$0xff]  ;;  %v63_v7 = vld [vmem:[%s550_s1] sm:$0x1]  ;;  %v69_v8 = vld [vmem:[#allocation5] sm:$0xff]  ;;  %s453_s11 = smov 96   ;;  %s454_s12 = smov 32  }
  0x20   :  { %322 = vmatpush3.msra.mxu0 %v72_v1  ;;  %333 = vmatpush3.msra.mxu1 %v158_v3  ;;  %65 = vst.msk [vmem:[#allocation2] sm:$0x1] %vm64_vm1, %v63_v7  ;;  %v68_v9 = vld [vmem:[%s549_s0] sm:$0x1]  ;;  %v155_v10 = vld [vmem:[#allocation8] sm:$0xff]  ;;  %v256_v31 = vshrl.u32 %v255_v30, 7 }
  0x21   :  { %323 = vmatprep.subr.mxu0 %v450_v0  ;;  %334 = vmatprep.subr.mxu1 %v450_v0  ;;  %v66_v12 = vld [vmem:[%s551_s2] sm:$0x1]  ;;  %v150_v23 = vld [vmem:[%s555_s6 + $0x1] sm:$0x1]  ;;  %v151_v25 = vld [vmem:[%s555_s6 + $0x2] sm:$0x1] }
  0x22   :  { %324 = vmatpush3.msra.mxu0 %v71_v2  ;;  %335 = vmatpush3.msra.mxu1 %v157_v5  ;;  %67 = vst.msk [vmem:[#allocation3] sm:$0x1] %vm64_vm1, %v66_v12  ;;  %v73_v13 = vld [vmem:[%s554_s5] sm:$0x1]  ;;  %v257_v34 = vsub.s32 0, %v256_v31 }
  0x23   :  { %325 = vmatprep.subr.mxu0 %v450_v0  ;;  %336 = vmatprep.subr.mxu1 %v450_v0  ;;  %v149_v19 = vld [vmem:[%s555_s6] sm:$0x1]  ;;  %s455_s6 = smov [#allocation11]  }
  0x24   :  { %326 = vmatpush3.msra.mxu0 %v70_v4  ;;  %337 = vmatpush3.msra.mxu1 %v156_v6 }
  0x25   :  { %327 = vmatprep.subr.mxu0 %v450_v0  ;;  %338 = vmatprep.subr.mxu1 %v450_v0 }
  0x26   :  { %328 = vmatpush3.msra.mxu0 %v69_v8  ;;  %339 = vmatpush3.msra.mxu1 %v155_v10 }
  0x27   :  { %330 = vmatmul.mubr.msk.f32.vlgmr.msra.gmra.mxu0 %vm74_vm2, %v68_v9  ;;  %v152_v11 = vld [vmem:[#allocation2] sm:$0x1] }
  0x28   :  { %341 = vmatmul.mubr.msk.f32.vlgmr.msra.gmra.mxu1 %vm74_vm2, %v152_v11 }
  0x29   :  { %v153_v28 = vld [vmem:[#allocation3] sm:$0x1] }
  0xe7   :  { %v144_v14 = vpop.f32.mrf.mxu0 }
  0xe8   :  { %v145_v15 = vadd.f32 %v144_v14, %v73_v13  ;;  %v228_v17 = vpop.f32.mrf.mxu1 }
  0xe9   :  { %v331_v16 = vpop.f32.mrf.mxu0 }
  0xea   :  { %148 = vst [vmem:[#allocation4] sm:$0x1] %v145_v15  ;;  %v342_v18 = vpop.f32.mrf.mxu1 }
  0xf1   :  { %v154_v20 = vld [vmem:[#allocation4] sm:$0x1] }
  0xf2   :  { %v232_v21 = vadd.f32 %v228_v17, %v154_v20 }
  0xf4   :  { %v233_v22 = vmul.f32 %v232_v21, %v149_v19 }
  0xf6   :  { %354 = vtanh.f32 %v233_v22 }
 0x103   :  { %v355_v24 = vpop.eup %354 }
 0x104   :  { %v235_v26 = vmul.f32 %v355_v24, %v150_v23 }
 0x106   :  { %v236_v27 = vadd.f32 %v235_v26, %v151_v25 }
 0x108   :  { %249 = vrot.lane.b32.xlu1 %v236_v27, %s452_s29  ;;  %253 = vst [vmem:[%s556_s7] sm:$0x1] %v236_v27  ;;  %238 = vrot.lane.b32.xlu0 %v236_v27, %s453_s11  ;;  %v242_v29 = vmul.f32 %v236_v27, %v153_v28  ;;  %s293_s7 = sshll.u32 %s455_s6, 4  ;;  %s294_s7 = int_to_ptr.vmem [resolvable:$true] %s293_s7 }
 0x109   :  { %s398_s13 = scalar_lea.vmem %s294_s7, 16  ;;  %s402_s14 = scalar_lea.vmem %s294_s7, 32 }
 0x10a   :  { %p399_p10 = scmp.ne.s32.totalorder %s294_s7, %s398_s13  ;;  %p403_p11 = scmp.lt.s32.totalorder %s294_s7, %s294_s7 }
 0x10b   :  { %p404_p12 = scmp.lt.s32.totalorder %s402_s14, %s398_s13 }
 0x10c   :  { %244 = vrot.lane.b32.xlu0 %v242_v29, %s454_s12 }
 0x10d   :  { %p405_p13 = por %p404_p12, %p403_p11 }
 0x10f   :  { %p406_p0 = pnand %p405_p13, %p399_p10 }
 0x17a   :  { %v239_v32 = vpop.permute.xlu0 %238  ;;  %v250_v39 = vpop.permute.xlu1 %249 }
 0x17b   :  { %v241_v33 = vmul.f32 %v239_v32, %v236_v27 }
 0x17e   :  { %v245_v35 = vpop.permute.xlu0 %244 }
 0x17f   :  { %v247_v36 = vadd.f32 %v245_v35, %v241_v33 }
 0x181   :  { %356 = vtanh.f32 %v247_v36  ;;  %v268_v37 = vrot.slane %v247_v36, %v257_v34 }
 0x183   :  { %269 = vrot.lane.b32.xlu0 %v268_v37, %s453_s11 }
 0x18e   :  { %v357_v38 = vpop.eup %356 }
 0x18f   :  { %v252_v40 = vmul.f32 %v357_v38, %v250_v39 }
 0x191   :  { %v258_v41 = vrot.slane %v252_v40, %v257_v34 }
 0x193   :  { %259 = vrot.lane.b32.xlu1 %v258_v41, %s453_s11 }
 0x1f5   :  { %v270_v42 = vpop.permute.xlu0 %269 }
 0x1f6   :  { %274 = vst.msk [vmem:[#allocation3] sm:$0x1] %vm64_vm1, %v270_v42  ;;  %272 = vst.msk [vmem:[#allocation11] sm:$0x1] %vm64_vm1, %v270_v42 }
 0x1f7   :  { %409 = shalt.err (!%p406_p0)
}
 0x1f8   :  { %296 = dma.vmem_to_hbm [thread:$0]  %s294_s7, 16, %s558_s9, [#allocation12]  }
 0x1f9   :  { %s456_s17 = smov [#allocation10]  }
 0x1fa   :  { %s283_s18 = sshll.u32 %s456_s17, 4  ;;  %s284_s18 = int_to_ptr.vmem [resolvable:$true] %s283_s18 }
 0x1fb   :  { %s418_s19 = scalar_lea.vmem %s284_s18, 16  ;;  %s422_s20 = scalar_lea.vmem %s284_s18, 32 }
 0x1fc   :  { %p419_p1 = scmp.ne.s32.totalorder %s284_s18, %s418_s19  ;;  %p423_p2 = scmp.lt.s32.totalorder %s284_s18, %s284_s18 }
 0x1fd   :  { %p424_p3 = scmp.lt.s32.totalorder %s422_s20, %s418_s19 }
 0x1ff   :  { %p425_p4 = por %p424_p3, %p423_p2 }
 0x201   :  { %p426_p5 = pnand %p425_p4, %p419_p1 }
 0x205   :  { %v260_v43 = vpop.permute.xlu1 %259 }
 0x206   :  { %273 = vst.msk [vmem:[#allocation2] sm:$0x1] %vm64_vm1, %v260_v43  ;;  %263 = vst.msk [vmem:[#allocation10] sm:$0x1] %vm64_vm1, %v260_v43 }
 0x207   :  { %429 = shalt.err (!%p426_p5)
}
 0x208   :  { %286 = dma.vmem_to_hbm [thread:$0]  %s284_s18, 16, %s557_s8, [#allocation7]  }
 0x209   :  { %442 = dma.done.wait [#allocation7], 16  }
 0x20a   :  { %443 = vsyncadd [#allocation7], 4294967280 }
 0x20b   :  { %444 = dma.done.wait [#allocation12], 16  }
 0x20c   :  { %445 = vsyncadd [#allocation12], 4294967280 }
 0x20d   :  { %305 = vsyncpa [#allocation6], 1 }
 0x20e   :  { %306 = vsyncpa [#allocation9], 1 }
 0x20f   :  { %307 = vsyncpa [#allocation7], 1 }
 0x210   :  { %308 = vsyncpa [#allocation12], 1 }

</bundles_post_ra>
